<compile_context>
chip_gen: v7x
topology: tpu7x:2x2x1
jax: 0.10.0
libtpu: 0.0.40
codegen_flags: <defaults>
</compile_context>

<pallas_src>
import jax
import jax.numpy as jnp
from jax.experimental import pallas as pl
from jax.experimental.pallas import tpu as pltpu


def _copy_kernel(x_ref, o_ref):
    # x_ref / o_ref: identical 2-D VMEM tiles — straight vld/vst copy.
    o_ref[...] = x_ref[...]


def _tiled_copy_2d(x2d: jax.Array, max_block_bytes: int = 4 * 1024 * 1024) -> jax.Array:
    """Lane-aware tiled memcpy of a 2-D array via pallas_call."""
    rows, width = x2d.shape
    itemsize = jnp.dtype(x2d.dtype).itemsize

    # Row-block size: full extent if small, otherwise a multiple of 8 sized so
    # one block is <= max_block_bytes (double-buffered in + out stays small).
    cap = max(8, (max_block_bytes // max(1, width * itemsize)) // 8 * 8)
    tb = rows if rows <= cap else cap
    grid = (pl.cdiv(rows, tb),)

    return pl.pallas_call(
        _copy_kernel,
        out_shape=jax.ShapeDtypeStruct((rows, width), x2d.dtype),
        grid_spec=pl.GridSpec(
            grid=grid,
            in_specs=[pl.BlockSpec((tb, width), lambda i: (i, 0))],
            out_specs=pl.BlockSpec((tb, width), lambda i: (i, 0)),
        ),
        compiler_params=pltpu.CompilerParams(
            # Independent row blocks: let Mosaic shard across TensorCores
            # (2 TCs on v7x) for this bandwidth-bound copy.
            dimension_semantics=("parallel",),
        ),
    )(x2d)


def squeeze_channels(x: jax.Array) -> jax.Array:
    """Pallas equivalent of SqueezeChannels.forward: (B, C, 1) -> (B, C)."""
    B, C, L = x.shape
    assert L == 1, f"SqueezeChannels expects size-1 dim 2, got {L}"

    # Metadata-only squeeze (no data movement); the kernel only sees 2-D data.
    x2d = jnp.squeeze(x, axis=2)
    n = B * C

    if n % 128 == 0:
        # Lane-dense path: fold the flat data into (rows, width) with width a
        # large multiple of 128 so every store is a full, unmasked vst.
        width = 128
        while width * 2 <= 2048 and n % (width * 2) == 0:
            width *= 2
        rows = n // width
        y = _tiled_copy_2d(x2d.reshape(rows, width))
        return y.reshape(B, C)

    # Fallback: channel axis at full extent (always a legal block shape even
    # when C is not a multiple of 128); rows tiled in multiples of 8.
    return _tiled_copy_2d(x2d)


if __name__ == "__main__":
    key = jax.random.PRNGKey(0)

    # Shapes consistent with the module's usage: (batch, channels, 1).
    B, C = 2, 4
    x = jax.random.normal(key, (B, C, 1), dtype=jnp.float32)
    y = jax.block_until_ready(squeeze_channels(x))
    y_ref = jnp.squeeze(x, axis=2)
    assert y.shape == (B, C), y.shape
    assert jnp.array_equal(y, y_ref), "mismatch vs reference squeeze (fallback path)"

    # Second small case that exercises the lane-dense copy path (B*C % 128 == 0).
    B2, C2 = 16, 64
    x2 = jax.random.normal(jax.random.PRNGKey(0), (B2, C2, 1), dtype=jnp.float32)
    y2 = jax.block_until_ready(squeeze_channels(x2))
    assert y2.shape == (B2, C2), y2.shape
    assert jnp.array_equal(y2, jnp.squeeze(x2, axis=2)), "mismatch (lane-dense path)"

    print("KERNEL_OK")
</pallas_src>

<mosaic_0001>
module attributes {stable_mosaic.version = 11 : i64} {
  func.func @_copy_kernel(%arg0: i32, %arg1: memref<2x4xf32, #tpu.memory_space<vmem>>, %arg2: memref<2x4xf32, #tpu.memory_space<vmem>>) attributes {dimension_semantics = [#tpu.dimension_semantics<parallel>], iteration_bounds = array<i64: 1>, scalar_prefetch = 0 : i64, scratch_operands = 0 : i64, tpu.core_type = #tpu.core_type<tc>, window_params = [{transform_indices = @transform_0, window_bounds = array<i64: 2, 4>}, {transform_indices = @transform_1, window_bounds = array<i64: 2, 4>}]} {
    %c0 = arith.constant 0 : index
    %c0_0 = arith.constant 0 : index
    %0 = vector.load %arg1[%c0, %c0_0] : memref<2x4xf32, #tpu.memory_space<vmem>>, vector<2x4xf32>
    %c0_1 = arith.constant 0 : index
    %c0_2 = arith.constant 0 : index
    %1 = vector.load %arg2[%c0_1, %c0_2] : memref<2x4xf32, #tpu.memory_space<vmem>>, vector<2x4xf32>
    tpu.vector_store %arg2[%c0_1, %c0_2], %0 {strides = array<i32>} : memref<2x4xf32, #tpu.memory_space<vmem>>, vector<2x4xf32>,
    return
  }
  func.func @transform_0(%arg0: i32) -> (i32, i32) {
    %c0_i32 = arith.constant 0 : i32
    %c0_i32_0 = arith.constant 0 : i32
    return %arg0, %c0_i32 : i32, i32
  }
  func.func @transform_1(%arg0: i32) -> (i32, i32) {
    %c0_i32 = arith.constant 0 : i32
    %c0_i32_0 = arith.constant 0 : i32
    return %arg0, %c0_i32 : i32, i32
  }
}

</mosaic_0001>

<bundles_post_ra>
// kernel: tpu_custom_call.1
= control target key start
LH: loop header
LB: loop body
LE: loop exit
PB: predicated region body
PF: predicated region fallthrough
CT: control target
= control target key end

     0   :  { %6 = vsyncpa [#allocation3], 0  ;;  %s125_s0 = inlined_call_operand.hbm [shape: f32[2,4], index: 0, kind: input, shape index: {}]   ;;  %s126_s1 = inlined_call_operand.hbm [shape: f32[2,4], index: 1, kind: output, shape index: {}]  }
   0x1   :  { %7 = vsyncpa [#allocation4], 0  ;;  %s89_s6 = smov [#allocation2]   ;;  %s41_s10 = scalar_lea.hbm %s125_s0, 32 }
   0x2   :  { %s14_s7 = sshll.u32 %s89_s6, 4  ;;  %p42_p0 = scmp.ne.s32.totalorder %s125_s0, %s41_s10  ;;  %s15_s7 = int_to_ptr.vmem [resolvable:$true] %s14_s7 }
   0x3   :  { %p45_p1 = scmp.lt.u32.totalorder %s41_s10, %s125_s0 }
   0x5   :  { %p47_p2 = pnand %p45_p1, %p42_p0 }
   0x7   :  { %50 = shalt.err (!%p47_p2)
}
   0x8   :  { %s51_s15 = scalar_lea.vmem %s15_s7, 32  ;;  %p56_p4 = scmp.lt.s32.totalorder %s15_s7, %s15_s7 }
   0x9   :  { %p52_p3 = scmp.ne.s32.totalorder %s15_s7, %s51_s15  ;;  %p57_p5 = scmp.lt.s32.totalorder %s51_s15, %s51_s15 }
   0xb   :  { %p58_p6 = por %p57_p5, %p56_p4 }
   0xd   :  { %p59_p7 = pnand %p58_p6, %p52_p3 }
   0xf   :  { %62 = shalt.err (!%p59_p7)
}
  0x10   :  { %17 = dma.hbm_to_vmem [thread:$0]  %s125_s0, 32, %s15_s7, [#allocation3]  }
  0x11   :  { %85 = dma.done.wait [#allocation3], 32  }
  0x12   :  { %86 = vsyncadd [#allocation3], 4294967264  ;;  %s90_s18 = smov [#allocation5]   ;;  %vm22_vm0 = vcmask 25600   ;;  %v21_v0 = vld [vmem:[#allocation2] sm:$0x3] }
  0x13   :  { %s30_s19 = sshll.u32 %s90_s18, 4  ;;  %23 = vst.msk [vmem:[#allocation5] sm:$0x3] %vm22_vm0, %v21_v0  ;;  %s31_s19 = int_to_ptr.vmem [resolvable:$true] %s30_s19 }
  0x14   :  { %s63_s20 = scalar_lea.vmem %s31_s19, 32  ;;  %p68_p9 = scmp.lt.s32.totalorder %s31_s19, %s31_s19 }
  0x15   :  { %p64_p8 = scmp.ne.s32.totalorder %s31_s19, %s63_s20  ;;  %p69_p10 = scmp.lt.s32.totalorder %s63_s20, %s63_s20 }
  0x17   :  { %p70_p11 = por %p69_p10, %p68_p9 }
  0x19   :  { %p71_p12 = pnand %p70_p11, %p64_p8 }
  0x1b   :  { %74 = shalt.err (!%p71_p12)
}
  0x1c   :  { %s75_s23 = scalar_lea.hbm %s126_s1, 32 }
  0x1d   :  { %p76_p13 = scmp.ne.s32.totalorder %s126_s1, %s75_s23  ;;  %p79_p0 = scmp.lt.u32.totalorder %s75_s23, %s126_s1 }
  0x1f   :  { %p81_p1 = pnand %p79_p0, %p76_p13 }
  0x21   :  { %84 = shalt.err (!%p81_p1)
}
  0x22   :  { %33 = dma.vmem_to_hbm [thread:$0]  %s31_s19, 32, %s126_s1, [#allocation4]  }
  0x23   :  { %87 = dma.done.wait [#allocation4], 32  }
  0x24   :  { %88 = vsyncadd [#allocation4], 4294967264 }
  0x25   :  { %37 = vsyncpa [#allocation3], 1 }
  0x26   :  { %38 = vsyncpa [#allocation4], 1 }

</bundles_post_ra>
